<compile_context>
chip_gen: v7x
topology: tpu7x:2x2x1
jax: 0.10.0
libtpu: 0.0.40
codegen_flags: <defaults>
</compile_context>

<pallas_src>
import jax
import jax.numpy as jnp
from jax.experimental import pallas as pl
from jax.experimental.pallas import tpu as pltpu

C_IN = 48    # conv2d4 in_channels  / conv2d5 out_channels
C_MID = 8    # conv2d4 out_channels / conv2d5 in_channels
_MAX_TILE_LANES = 16   # max spatial tile = 16 * 128 = 2048 lanes (f32: ~0.4 MiB/tile)


# --------------------------------------------------------------------------- #
# Kernel 1: the tiny SE gate (runs once, outside the spatial loop).
# --------------------------------------------------------------------------- #
def _gate_kernel(x12_ref, w1_ref, b1_ref, w2_ref, b2_ref, s_ref):
    # x12_ref: (C_IN, 1)   squeezed input column
    # w1_ref : (C_MID, C_IN), b1_ref: (C_MID, 1)
    # w2_ref : (C_IN, C_MID), b2_ref: (C_IN, 1)
    # s_ref  : (C_IN, 1)   sigmoid gate (f32)
    h = jnp.dot(w1_ref[...], x12_ref[...],
                preferred_element_type=jnp.float32) + b1_ref[...]
    h = jnp.maximum(h, 0.0)                                      # ReLU
    z = jnp.dot(w2_ref[...], h,
                preferred_element_type=jnp.float32) + b2_ref[...]
    s_ref[...] = jax.nn.sigmoid(z)                               # Sigmoid


# --------------------------------------------------------------------------- #
# Kernel 2: HBM-bound broadcast multiply, tiled over the spatial axis.
# --------------------------------------------------------------------------- #
def _scale_kernel(s_ref, x_ref, o_ref):
    # s_ref: (C_IN, 1) f32 gate (resident, constant index_map)
    # x_ref: (C_IN, TILE_HW) input tile
    # o_ref: (C_IN, TILE_HW) output tile
    o_ref[...] = (x_ref[...].astype(jnp.float32) * s_ref[...]).astype(o_ref.dtype)


def _round_up(x, m):
    return (x + m - 1) // m * m


def _pick_tile_lanes(hw_pad):
    """Largest multiple-of-128 tile (<= _MAX_TILE_LANES*128) that evenly divides
    the padded spatial axis, so every block is full and lane-dense."""
    n128 = hw_pad // 128
    best = 1
    for t in range(1, min(n128, _MAX_TILE_LANES) + 1):
        if n128 % t == 0:
            best = t
    return best * 128


@jax.jit
def se_forward(x12, x11, w1, b1, w2, b2):
    """x12: (1, C_IN, 1, 1), x11: (1, C_IN, H, W) -> (1, C_IN, H, W)."""
    n, c, h, w = x11.shape
    assert n == 1 and c == C_IN  # module spec fixes N=1; fold N into HW if ever needed
    hw = h * w

    # ---- gate: conv2d4 -> relu -> conv2d5 -> sigmoid (tiny, single invocation)
    s = pl.pallas_call(
        _gate_kernel,
        out_shape=jax.ShapeDtypeStruct((C_IN, 1), jnp.float32),
    )(
        x12.reshape(C_IN, 1).astype(jnp.float32),
        w1.astype(jnp.float32),
        b1.reshape(C_MID, 1).astype(jnp.float32),
        w2.astype(jnp.float32),
        b2.reshape(C_IN, 1).astype(jnp.float32),
    )

    # ---- scale: stream x11 through VMEM in lane-dense tiles and apply the gate
    x_flat = x11.reshape(C_IN, hw)
    hw_pad = _round_up(hw, 128)
    if hw_pad != hw:
        x_flat = jnp.pad(x_flat, ((0, 0), (0, hw_pad - hw)))
    tile_hw = _pick_tile_lanes(hw_pad)
    grid = (hw_pad // tile_hw,)

    out_flat = pl.pallas_call(
        _scale_kernel,
        out_shape=jax.ShapeDtypeStruct((C_IN, hw_pad), x11.dtype),
        grid=grid,
        in_specs=[
            pl.BlockSpec((C_IN, 1), lambda i: (0, 0)),        # gate: resident
            pl.BlockSpec((C_IN, tile_hw), lambda i: (0, i)),  # x11 tile
        ],
        out_specs=pl.BlockSpec((C_IN, tile_hw), lambda i: (0, i)),
        compiler_params=pltpu.CompilerParams(
            dimension_semantics=("parallel",),                # shard tiles across TCs (v7x)
        ),
    )(s, x_flat)

    return out_flat[:, :hw].reshape(1, C_IN, h, w)


def _reference(x12, x11, w1, b1, w2, b2):
    v = x12.reshape(C_IN)
    hgt = jnp.maximum(w1 @ v + b1, 0.0)
    s = jax.nn.sigmoid(w2 @ hgt + b2)
    return x11 * s.reshape(1, C_IN, 1, 1)


if __name__ == "__main__":
    key = jax.random.PRNGKey(0)
    k1, k2, k3, k4, k5, k6 = jax.random.split(key, 6)

    # Shapes from the module: x11 (1, 48, 56, 56), x12 (1, 48, 1, 1).
    H = W = 56
    x11 = jax.random.normal(k1, (1, C_IN, H, W), dtype=jnp.float32)
    x12 = jax.random.normal(k2, (1, C_IN, 1, 1), dtype=jnp.float32)

    # Synthetic parameters (conv weights (out,in,1,1) stored as (out,in) matrices).
    w1 = jax.random.normal(k3, (C_MID, C_IN), dtype=jnp.float32) * 0.1  # conv2d4.weight
    b1 = jax.random.normal(k4, (C_MID,), dtype=jnp.float32) * 0.1       # conv2d4.bias
    w2 = jax.random.normal(k5, (C_IN, C_MID), dtype=jnp.float32) * 0.1  # conv2d5.weight
    b2 = jax.random.normal(k6, (C_IN,), dtype=jnp.float32) * 0.1        # conv2d5.bias

    out = se_forward(x12, x11, w1, b1, w2, b2)
    out = jax.block_until_ready(out)

    ref = _reference(x12, x11, w1, b1, w2, b2)
    assert out.shape == (1, C_IN, H, W)
    assert jnp.allclose(out, ref, atol=1e-5, rtol=1e-5)

    print("KERNEL_OK")
</pallas_src>

<mosaic_0001>
module attributes {stable_mosaic.version = 11 : i64} {
  func.func @_gate_kernel(%arg0: memref<48x1xf32, #tpu.memory_space<vmem>>, %arg1: memref<8x48xf32, #tpu.memory_space<vmem>>, %arg2: memref<8x1xf32, #tpu.memory_space<vmem>>, %arg3: memref<48x8xf32, #tpu.memory_space<vmem>>, %arg4: memref<48x1xf32, #tpu.memory_space<vmem>>, %arg5: memref<48x1xf32, #tpu.memory_space<vmem>>) attributes {dimension_semantics = [], scalar_prefetch = 0 : i64, scratch_operands = 0 : i64, tpu.core_type = #tpu.core_type<tc>} {
    %c0 = arith.constant 0 : index
    %c0_0 = arith.constant 0 : index
    %0 = vector.load %arg1[%c0, %c0_0] : memref<8x48xf32, #tpu.memory_space<vmem>>, vector<8x48xf32>
    %c0_1 = arith.constant 0 : index
    %c0_2 = arith.constant 0 : index
    %1 = vector.load %arg0[%c0_1, %c0_2] : memref<48x1xf32, #tpu.memory_space<vmem>>, vector<48x1xf32>
    %cst = arith.constant dense<0.000000e+00> : vector<8x1xf32>
    %2 = tpu.matmul %0, %1, %cst {dimension_numbers = #tpu.dot_dimension_numbers<[1], [0], [0], [1], [0, 0, 1, 1], [], []>} : vector<8x48xf32>, vector<48x1xf32>, vector<8x1xf32> -> vector<8x1xf32>
    %c0_3 = arith.constant 0 : index
    %c0_4 = arith.constant 0 : index
    %3 = vector.load %arg2[%c0_3, %c0_4] : memref<8x1xf32, #tpu.memory_space<vmem>>, vector<8x1xf32>
    %4 = arith.addf %2, %3 : vector<8x1xf32>
    %cst_5 = arith.constant 0.000000e+00 : f32
    %5 = vector.broadcast %cst_5 : f32 to vector<8x1xf32>
    %6 = arith.maximumf %4, %5 : vector<8x1xf32>
    %c0_6 = arith.constant 0 : index
    %c0_7 = arith.constant 0 : index
    %7 = vector.load %arg3[%c0_6, %c0_7] : memref<48x8xf32, #tpu.memory_space<vmem>>, vector<48x8xf32>
    %cst_8 = arith.constant dense<0.000000e+00> : vector<48x1xf32>
    %8 = tpu.matmul %7, %6, %cst_8 {dimension_numbers = #tpu.dot_dimension_numbers<[1], [0], [0], [1], [0, 0, 1, 1], [], []>} : vector<48x8xf32>, vector<8x1xf32>, vector<48x1xf32> -> vector<48x1xf32>
    %c0_9 = arith.constant 0 : index
    %c0_10 = arith.constant 0 : index
    %9 = vector.load %arg4[%c0_9, %c0_10] : memref<48x1xf32, #tpu.memory_space<vmem>>, vector<48x1xf32>
    %10 = arith.addf %8, %9 : vector<48x1xf32>
    %11 = arith.negf %10 : vector<48x1xf32>
    %12 = math.exp %11 : vector<48x1xf32>
    %cst_11 = arith.constant 1.000000e+00 : f32
    %13 = vector.broadcast %cst_11 : f32 to vector<48x1xf32>
    %14 = arith.addf %13, %12 : vector<48x1xf32>
    %15 = arith.divf %13, %14 : vector<48x1xf32>
    %c0_12 = arith.constant 0 : index
    %c0_13 = arith.constant 0 : index
    %16 = vector.load %arg5[%c0_12, %c0_13] : memref<48x1xf32, #tpu.memory_space<vmem>>, vector<48x1xf32>
    tpu.vector_store %arg5[%c0_12, %c0_13], %15 {strides = array<i32>} : memref<48x1xf32, #tpu.memory_space<vmem>>, vector<48x1xf32>,
    return
  }
}

module attributes {stable_mosaic.version = 11 : i64} {
  func.func @_scale_kernel(%arg0: i32, %arg1: memref<48x1xf32, #tpu.memory_space<vmem>>, %arg2: memref<48x640xf32, #tpu.memory_space<vmem>>, %arg3: memref<48x640xf32, #tpu.memory_space<vmem>>) attributes {dimension_semantics = [#tpu.dimension_semantics<parallel>], iteration_bounds = array<i64: 5>, scalar_prefetch = 0 : i64, scratch_operands = 0 : i64, tpu.core_type = #tpu.core_type<tc>, window_params = [{pipeline_mode = #tpu.pipeline_mode<synchronous>, transform_indices = @transform_0, window_bounds = array<i64: 48, 1>}, {transform_indices = @transform_1, window_bounds = array<i64: 48, 640>}, {transform_indices = @transform_2, window_bounds = array<i64: 48, 640>}]} {
    %c0 = arith.constant 0 : index
    %c0_0 = arith.constant 0 : index
    %0 = vector.load %arg2[%c0, %c0_0] : memref<48x640xf32, #tpu.memory_space<vmem>>, vector<48x640xf32>
    %c0_1 = arith.constant 0 : index
    %c0_2 = arith.constant 0 : index
    %1 = vector.load %arg1[%c0_1, %c0_2] : memref<48x1xf32, #tpu.memory_space<vmem>>, vector<48x1xf32>
    %2 = vector.broadcast %1 : vector<48x1xf32> to vector<48x640xf32>
    %3 = arith.mulf %0, %2 : vector<48x640xf32>
    %c0_3 = arith.constant 0 : index
    %c0_4 = arith.constant 0 : index
    %4 = vector.load %arg3[%c0_3, %c0_4] : memref<48x640xf32, #tpu.memory_space<vmem>>, vector<48x640xf32>
    tpu.vector_store %arg3[%c0_3, %c0_4], %3 {strides = array<i32>} : memref<48x640xf32, #tpu.memory_space<vmem>>, vector<48x640xf32>,
    return
  }
  func.func @transform_0(%arg0: i32) -> (i32, i32) {
    %c0_i32 = arith.constant 0 : i32
    %c0_i32_0 = arith.constant 0 : i32
    %c0_i32_1 = arith.constant 0 : i32
    return %c0_i32, %c0_i32_0 : i32, i32
  }
  func.func @transform_1(%arg0: i32) -> (i32, i32) {
    %c0_i32 = arith.constant 0 : i32
    %c0_i32_0 = arith.constant 0 : i32
    return %c0_i32, %arg0 : i32, i32
  }
  func.func @transform_2(%arg0: i32) -> (i32, i32) {
    %c0_i32 = arith.constant 0 : i32
    %c0_i32_0 = arith.constant 0 : i32
    return %c0_i32, %arg0 : i32, i32
  }
}

</mosaic_0001>

<bundles_post_ra>
// kernel: se_forward.2
= control target key start
LH: loop header
LB: loop body
LE: loop exit
PB: predicated region body
PF: predicated region fallthrough
CT: control target
= control target key end

     0   :  { %10 = vsyncpa [#allocation3], 0  ;;  %s403_s18 = smov [#allocation2]   ;;  %s530_s0 = inlined_call_operand.vmem [shape: f32[48,1], index: 0, kind: input, shape index: {}]   ;;  %s531_s1 = inlined_call_operand.hbm [shape: f32[8,48], index: 1, kind: input, shape index: {}]   ;;  %s532_s2 = inlined_call_operand.vmem [shape: f32[8,1], index: 2, kind: input, shape index: {}]   ;;  %s533_s3 = inlined_call_operand.vmem [shape: f32[48,8], index: 3, kind: input, shape index: {}]   ;;  %s534_s4 = inlined_call_operand.vmem [shape: f32[48,1], index: 4, kind: input, shape index: {}]   ;;  %s535_s5 = inlined_call_operand.vmem [shape: f32[48,1], index: 5, kind: output, shape index: {}]  }
   0x1   :  { %s19_s19 = sshll.u32 %s403_s18, 4  ;;  %s379_s22 = scalar_lea.hbm %s531_s1, 128  ;;  %s20_s19 = int_to_ptr.vmem [resolvable:$true] %s19_s19 }
   0x2   :  { %p380_p0 = scmp.ne.s32.totalorder %s531_s1, %s379_s22  ;;  %p383_p1 = scmp.lt.u32.totalorder %s379_s22, %s531_s1 }
   0x4   :  { %p385_p2 = pnand %p383_p1, %p380_p0 }
   0x6   :  { %388 = shalt.err (!%p385_p2)
}
   0x7   :  { %s389_s27 = scalar_lea.vmem %s20_s19, 128  ;;  %p394_p4 = scmp.lt.s32.totalorder %s20_s19, %s20_s19 }
   0x8   :  { %p390_p3 = scmp.ne.s32.totalorder %s20_s19, %s389_s27  ;;  %p395_p5 = scmp.lt.s32.totalorder %s389_s27, %s389_s27 }
   0xa   :  { %p396_p6 = por %p395_p5, %p394_p4 }
   0xc   :  { %p397_p7 = pnand %p396_p6, %p390_p3 }
   0xe   :  { %400 = shalt.err (!%p397_p7)
}
   0xf   :  { %22 = dma.hbm_to_vmem [thread:$0]  %s531_s1, 128, %s20_s19, [#allocation3]  }
  0x10   :  { %401 = dma.done.wait [#allocation3], 128  }
  0x11   :  { %402 = vsyncadd [#allocation3], 4294967168  ;;  %v404_v0 = vmov 0.0|0.0   ;;  %vm405_vm0 = vmmov 0   ;;  %v406_v1 = vmov 0.0   ;;  %v33_v2 = vld [vmem:[%s530_s0] sm:$0xff] }
  0x12   :  { %342 = vmatprep.subr.bf16.mxu0 %v404_v0  ;;  %328 = vmatprep.mubr.msk.f32.mxu0 %vm405_vm0, %v406_v1  ;;  %v34_v3 = vld [vmem:[%s530_s0 + $0x8] sm:$0xff]  ;;  %v35_v4 = vld [vmem:[%s530_s0 + $0x10] sm:$0xff]  ;;  %v36_v6 = vld [vmem:[%s530_s0 + $0x18] sm:$0xff]  ;;  %vm40_vm1 = vcmask 392192   ;;  %vm127_vm2 = vcmask 64512   ;;  %vm277_vm3 = vcmask 7168  }
  0x13   :  { %v343_v5 = vpack.c.bf16 %v34_v3, %v33_v2  ;;  %v346_v7 = vpack.c.bf16 %v36_v6, %v35_v4  ;;  %v37_v8 = vld [vmem:[%s530_s0 + $0x20] sm:$0xff]  ;;  %v38_v9 = vld [vmem:[%s530_s0 + $0x28] sm:$0xff]  ;;  %v117_v19 = vld [vmem:[%s533_s3 + $0x10] sm:$0xff] }
  0x14   :  { %v349_v10 = vpack.c.bf16 %v38_v9, %v37_v8  ;;  %v32_v11 = vld [vmem:[#allocation2] sm:$0xff]  ;;  %v116_v18 = vld [vmem:[%s533_s3 + $0x8] sm:$0xff]  ;;  %v118_v20 = vld [vmem:[%s533_s3 + $0x18] sm:$0xff] }
  0x15   :  { %344 = vmatpush3.bf16.msra.mxu0 %v343_v5  ;;  %v115_v12 = vld [vmem:[%s533_s3] sm:$0xff]  ;;  %v120_v22 = vld [vmem:[%s533_s3 + $0x28] sm:$0xff]  ;;  %v124_v29 = vld [vmem:[%s534_s4 + $0x18] sm:$0xff] }
  0x16   :  { %345 = vmatprep.subr.bf16.mxu0 %v404_v0  ;;  %333 = vmatprep.mubr.msk.f32.mxu1 %vm127_vm2, %v115_v12  ;;  %v39_v13 = vld [vmem:[%s532_s2] sm:$0xff]  ;;  %v122_v23 = vld [vmem:[%s534_s4 + $0x8] sm:$0xff]  ;;  %v123_v31 = vld [vmem:[%s534_s4 + $0x10] sm:$0xff] }
  0x17   :  { %v119_v21 = vld [vmem:[%s533_s3 + $0x20] sm:$0xff]  ;;  %v126_v37 = vld [vmem:[%s534_s4 + $0x28] sm:$0xff] }
  0x18   :  { %v121_v24 = vld [vmem:[%s534_s4] sm:$0xff] }
  0x19   :  { %347 = vmatpush3.bf16.msra.mxu0 %v346_v7  ;;  %v125_v39 = vld [vmem:[%s534_s4 + $0x20] sm:$0xff] }
  0x1a   :  { %348 = vmatprep.subr.bf16.mxu0 %v404_v0 }
  0x1d   :  { %350 = vmatpush3.bf16.msra.mxu0 %v349_v10 }
  0x20   :  { %329 = vmatmul.mubr.msk.f32.vlgmr.msra.gmra.mrb[0].mxu0 %vm40_vm1, %v32_v11 }
  0xf3   :  { %v110_v14 = vpop.f32.mrb[0].mxu0 }
  0xf4   :  { %v111_v15 = vadd.f32 %v110_v14, %v39_v13  ;;  %v330_v16 = vpop.f32.mrb[1].mxu0 }
  0xf6   :  { %v114_v17 = vmax.f32 %v111_v15, 0.0 }
  0xf8   :  { %331 = vmatprep.subr.mxu1 %v114_v17 }
  0xf9   :  { %332 = vmatpush3.msra.mxu1 %v114_v17 }
  0xfa   :  { %334 = vmatmul.mubr.msk.f32.vlgmr.msra.gmra.mrb[0].mxu1 %vm127_vm2, %v116_v18 }
  0xfb   :  { %336 = vmatprep.mubr.msk.f32.mxu1 %vm127_vm2, %v117_v19 }
  0xfe   :  { %337 = vmatmul.mubr.msk.f32.gmra.mrb[2].mxu1 %vm127_vm2, %v118_v20 }
  0xff   :  { %339 = vmatprep.mubr.msk.f32.mxu1 %vm127_vm2, %v119_v21 }
 0x102   :  { %340 = vmatmul.mubr.msk.f32.gmra.mrb[4].mxu1 %vm127_vm2, %v120_v22 }
 0x1cd   :  { %v335_v25 = vpop.f32.mrb[0].mxu1 }
 0x1ce   :  { %v218_v26 = vadd.f32 %v335_v25, %v122_v23  ;;  %v212_v27 = vpop.f32.mrb[1].mxu1 }
 0x1cf   :  { %v213_v28 = vadd.f32 %v212_v27, %v121_v24 }
 0x1d0   :  { %v297_v30 = vmul.f32 -1.442695, %v218_v26 }
 0x1d1   :  { %v296_v32 = vmul.f32 -1.442695, %v213_v28  ;;  %v338_v33 = vpop.f32.mrb[2].mxu1 }
 0x1d2   :  { %355 = vpow2.f32 %v297_v30  ;;  %v228_v34 = vadd.f32 %v338_v33, %v124_v29  ;;  %v222_v35 = vpop.f32.mrb[3].mxu1 }
 0x1d3   :  { %357 = vpow2.f32 %v296_v32  ;;  %v223_v36 = vadd.f32 %v222_v35, %v123_v31 }
 0x1d4   :  { %v299_v38 = vmul.f32 -1.442695, %v228_v34 }
 0x1d5   :  { %v298_v40 = vmul.f32 -1.442695, %v223_v36  ;;  %v341_v41 = vpop.f32.mrb[4].mxu1 }
 0x1d6   :  { %359 = vpow2.f32 %v299_v38  ;;  %v238_v42 = vadd.f32 %v341_v41, %v126_v37  ;;  %v232_v43 = vpop.f32.mrb[5].mxu1 }
 0x1d7   :  { %361 = vpow2.f32 %v298_v40  ;;  %v233_v44 = vadd.f32 %v232_v43, %v125_v39 }
 0x1d8   :  { %v301_v45 = vmul.f32 -1.442695, %v238_v42 }
 0x1d9   :  { %v300_v46 = vmul.f32 -1.442695, %v233_v44 }
 0x1da   :  { %363 = vpow2.f32 %v301_v45 }
 0x1db   :  { %365 = vpow2.f32 %v300_v46 }
 0x1dc   :  { %v356_v47 = vpop.eup %355 }
 0x1dd   :  { %v358_v48 = vpop.eup %357  ;;  %v260_v49 = vadd.f32 1.0, %v356_v47 }
 0x1de   :  { %v259_v50 = vadd.f32 1.0, %v358_v48 }
 0x1df   :  { %367 = vrcp.f32 %v260_v49 }
 0x1e0   :  { %v360_v51 = vpop.eup %359  ;;  %369 = vrcp.f32 %v259_v50 }
 0x1e1   :  { %v362_v52 = vpop.eup %361  ;;  %v262_v53 = vadd.f32 1.0, %v360_v51 }
 0x1e2   :  { %v261_v54 = vadd.f32 1.0, %v362_v52 }
 0x1e3   :  { %371 = vrcp.f32 %v262_v53 }
 0x1e4   :  { %v364_v55 = vpop.eup %363  ;;  %373 = vrcp.f32 %v261_v54 }
 0x1e5   :  { %v366_v56 = vpop.eup %365  ;;  %v264_v57 = vadd.f32 1.0, %v364_v55 }
 0x1e6   :  { %v263_v58 = vadd.f32 1.0, %v366_v56 }
 0x1e7   :  { %375 = vrcp.f32 %v264_v57 }
 0x1e8   :  { %377 = vrcp.f32 %v263_v58 }
 0x1e9   :  { %v368_v59 = vpop.eup %367 }
 0x1ea   :  { %v370_v60 = vpop.eup %369  ;;  %279 = vst.msk [vmem:[%s535_s5 + $0x8] sm:$0xff] %vm277_vm3, %v368_v59 }
 0x1eb   :  { %278 = vst.msk [vmem:[%s535_s5] sm:$0xff] %vm277_vm3, %v370_v60 }
 0x1ed   :  { %v372_v61 = vpop.eup %371 }
 0x1ee   :  { %v374_v62 = vpop.eup %373  ;;  %281 = vst.msk [vmem:[%s535_s5 + $0x18] sm:$0xff] %vm277_vm3, %v372_v61 }
 0x1ef   :  { %280 = vst.msk [vmem:[%s535_s5 + $0x10] sm:$0xff] %vm277_vm3, %v374_v62 }
 0x1f1   :  { %v376_v63 = vpop.eup %375 }
 0x1f2   :  { %v378_v0 = vpop.eup %377  ;;  %283 = vst.msk [vmem:[%s535_s5 + $0x28] sm:$0xff] %vm277_vm3, %v376_v63 }
 0x1f3   :  { %282 = vst.msk [vmem:[%s535_s5 + $0x20] sm:$0xff] %vm277_vm3, %v378_v0 }
 0x1f4   :  { %288 = vsyncpa [#allocation3], 1 }

// kernel: se_forward.3
= control target key start
LH: loop header
LB: loop body
LE: loop exit
PB: predicated region body
PF: predicated region fallthrough
CT: control target
= control target key end

     0   :  { %s565_s9 = smov 0   ;;  %s567_s10 = smov 0   ;;  %s833_s0 = inlined_call_operand.vmem [shape: f32[48,1], index: 0, kind: input, shape index: {}]   ;;  %s834_s1 = inlined_call_operand.vmem [shape: f32[48,3200], index: 1, kind: input, shape index: {}]   ;;  %s835_s2 = inlined_call_operand.vmem [shape: f32[48,3200], index: 2, kind: output, shape index: {}]  }
   0x1   :  { %s569_s11 = smov 0  }
   0x2 LB: > { %s485_s12 = sadd.s32 4294967295, %s547_s11   ;;  %s582_s13 = sadd.s32 1, %s547_s11   ;;  %s547_s11 = sphi %s569_s11, %s839_s11   ;;  %s543_s10 = sphi %s567_s10, %s838_s10   ;;  %s539_s9 = sphi %s565_s9, %s837_s9  }
   0x3   : > { %s37_s14 = ssub.s32 %s547_s11, %s582_s13  ;;  %s40_s15 = sadd.s32 1, %s543_s10 }
   0x4   : > { %p38_p0 = scmp.eq.s32.totalorder %s37_s14, 0  ;;  %p47_p1 = scmp.ne.s32.totalorder %s543_s10, %s539_s9 }
   0x5   : > { %p48_p2 = scmp.eq.s32.totalorder %s547_s11, 0  ;;  %p77_p3 = scmp.eq.s32.totalorder %s485_s12, 4 }
   0x6   : > { %s593_s16 = scalar_select %p38_p0, %s543_s10, %s40_s15  }
   0x7   : > { %p49_p4 = por %p48_p2, %p47_p1  ;;  %p595_p5 = por %p77_p3, %p47_p1 }
   0x8   : > { %p488_p6 = scmp.ge.s32.totalorder %s547_s11, 5 }
   0xa   : > { %102 = sbr.rel (%p488_p6) target bundleno = 37 (0x25), region = 20 }
  0x11   : > { %105 = sbr.rel (!%p49_p4) target bundleno = 37 (0x25), region = 24  ;;  %s107_s18 = sand.u32 (%p49_p4), 1, %s543_s10  }
  0x12   : > { %s494_s19 = smul.u32 (%p49_p4), 40, %s547_s11 }
  0x13   : > { %s496_s20 = smul.u32 (%p49_p4), 240, %s107_s18 }
  0x14   : > { %s605_s23 = scalar_lea.vmem (%p49_p4), %s834_s1, %s494_s19 }
  0x15   : > { %v125_v0 = vld [vmem:[%s605_s23] sm:$0xff] (%p49_p4)  ;;  %v127_v1 = vld [vmem:[%s605_s23 + $0x8] sm:$0xff] (%p49_p4)  ;;  %v129_v2 = vld [vmem:[%s605_s23 + $0x10] sm:$0xff] (%p49_p4)  ;;  %s610_s24 = scalar_lea.vmem (%p49_p4), [#allocation2], %s496_s20 }
  0x16   : > { %126 = vst [vmem:[%s610_s24] sm:$0xff] (%p49_p4), %v125_v0  ;;  %128 = vst [vmem:[%s610_s24 + $0x8] sm:$0xff] (%p49_p4), %v127_v1  ;;  %v131_v3 = vld [vmem:[%s605_s23 + $0x18] sm:$0xff] (%p49_p4)  ;;  %v133_v4 = vld [vmem:[%s605_s23 + $0x20] sm:$0xff] (%p49_p4) }
  0x17   : > { %130 = vst [vmem:[%s610_s24 + $0x10] sm:$0xff] (%p49_p4), %v129_v2  ;;  %v135_v5 = vld [vmem:[%s605_s23 + $0xc8] sm:$0xff] (%p49_p4)  ;;  %132 = vst [vmem:[%s610_s24 + $0x18] sm:$0xff] (%p49_p4), %v131_v3  ;;  %v137_v6 = vld [vmem:[%s605_s23 + $0xd0] sm:$0xff] (%p49_p4) }
  0x18   : > { %134 = vst [vmem:[%s610_s24 + $0x20] sm:$0xff] %v133_v4  ;;  %136 = vst [vmem:[%s610_s24 + $0x28] sm:$0xff] %v135_v5  ;;  %v139_v7 = vld [vmem:[%s605_s23 + $0xd8] sm:$0xff]  ;;  %v141_v8 = vld [vmem:[%s605_s23 + $0xe0] sm:$0xff] }
  0x19   : > { %138 = vst [vmem:[%s610_s24 + $0x30] sm:$0xff] %v137_v6  ;;  %140 = vst [vmem:[%s610_s24 + $0x38] sm:$0xff] %v139_v7  ;;  %v143_v9 = vld [vmem:[%s605_s23 + $0xe8] sm:$0xff]  ;;  %v145_v10 = vld [vmem:[%s605_s23 + $0x190] sm:$0xff] }
  0x1a   : > { %142 = vst [vmem:[%s610_s24 + $0x40] sm:$0xff] %v141_v8  ;;  %v147_v11 = vld [vmem:[%s605_s23 + $0x198] sm:$0xff]  ;;  %144 = vst [vmem:[%s610_s24 + $0x48] sm:$0xff] %v143_v9  ;;  %v149_v12 = vld [vmem:[%s605_s23 + $0x1a0] sm:$0xff] }
  0x1b   : > { %146 = vst [vmem:[%s610_s24 + $0x50] sm:$0xff] %v145_v10  ;;  %148 = vst [vmem:[%s610_s24 + $0x58] sm:$0xff] %v147_v11  ;;  %v151_v13 = vld [vmem:[%s605_s23 + $0x1a8] sm:$0xff]  ;;  %v153_v14 = vld [vmem:[%s605_s23 + $0x1b0] sm:$0xff] }
  0x1c   : > { %150 = vst [vmem:[%s610_s24 + $0x60] sm:$0xff] %v149_v12  ;;  %152 = vst [vmem:[%s610_s24 + $0x68] sm:$0xff] %v151_v13  ;;  %v155_v15 = vld [vmem:[%s605_s23 + $0x258] sm:$0xff]  ;;  %v157_v16 = vld [vmem:[%s605_s23 + $0x260] sm:$0xff] }
  0x1d   : > { %154 = vst [vmem:[%s610_s24 + $0x70] sm:$0xff] %v153_v14  ;;  %v159_v17 = vld [vmem:[%s605_s23 + $0x268] sm:$0xff]  ;;  %156 = vst [vmem:[%s610_s24 + $0x78] sm:$0xff] %v155_v15  ;;  %v161_v18 = vld [vmem:[%s605_s23 + $0x270] sm:$0xff] }
  0x1e   : > { %158 = vst [vmem:[%s610_s24 + $0x80] sm:$0xff] %v157_v16  ;;  %160 = vst [vmem:[%s610_s24 + $0x88] sm:$0xff] %v159_v17  ;;  %v163_v19 = vld [vmem:[%s605_s23 + $0x278] sm:$0xff]  ;;  %v165_v20 = vld [vmem:[%s605_s23 + $0x320] sm:$0xff] }
  0x1f   : > { %162 = vst [vmem:[%s610_s24 + $0x90] sm:$0xff] %v161_v18  ;;  %164 = vst [vmem:[%s610_s24 + $0x98] sm:$0xff] %v163_v19  ;;  %v167_v21 = vld [vmem:[%s605_s23 + $0x328] sm:$0xff]  ;;  %v169_v22 = vld [vmem:[%s605_s23 + $0x330] sm:$0xff] }
  0x20   : > { %166 = vst [vmem:[%s610_s24 + $0xa0] sm:$0xff] %v165_v20  ;;  %v171_v23 = vld [vmem:[%s605_s23 + $0x338] sm:$0xff]  ;;  %168 = vst [vmem:[%s610_s24 + $0xa8] sm:$0xff] %v167_v21  ;;  %v173_v24 = vld [vmem:[%s605_s23 + $0x340] sm:$0xff] }
  0x21   : > { %170 = vst [vmem:[%s610_s24 + $0xb0] sm:$0xff] %v169_v22  ;;  %172 = vst [vmem:[%s610_s24 + $0xb8] sm:$0xff] %v171_v23  ;;  %v175_v25 = vld [vmem:[%s605_s23 + $0x3e8] sm:$0xff]  ;;  %v177_v26 = vld [vmem:[%s605_s23 + $0x3f0] sm:$0xff] }
  0x22   : > { %174 = vst [vmem:[%s610_s24 + $0xc0] sm:$0xff] %v173_v24  ;;  %176 = vst [vmem:[%s610_s24 + $0xc8] sm:$0xff] %v175_v25  ;;  %v179_v27 = vld [vmem:[%s605_s23 + $0x3f8] sm:$0xff]  ;;  %v181_v28 = vld [vmem:[%s605_s23 + $0x400] sm:$0xff] }
  0x23   : > { %178 = vst [vmem:[%s610_s24 + $0xd0] sm:$0xff] %v177_v26  ;;  %v183_v29 = vld [vmem:[%s605_s23 + $0x408] sm:$0xff]  ;;  %180 = vst [vmem:[%s610_s24 + $0xd8] sm:$0xff] %v179_v27 }
  0x24   : > { %182 = vst [vmem:[%s610_s24 + $0xe0] sm:$0xff] %v181_v28  ;;  %184 = vst [vmem:[%s610_s24 + $0xe8] sm:$0xff] %v183_v29 }
  0x25 PF: > { %p490_p7 = scmp.ge.s32.totalorder %s547_s11, 1  ;;  %p189_p8 = scmp.lt.s32.totalorder %s547_s11, 6 }
  0x27   : > { %p190_p9 = pnand %p490_p7, %p189_p8 }
  0x28   : > { %v250_v30 = vld [vmem:[%s833_s0 + $0x10] sm:$0xff] (!%p190_p9)  ;;  %v248_v31 = vld [vmem:[%s833_s0] sm:$0xff] (!%p190_p9)  ;;  %v549_v32 = vmov (!%p190_p9), 0   ;;  %v251_v33 = vld [vmem:[%s833_s0 + $0x18] sm:$0xff] (!%p190_p9)  ;;  %s196_s14 = sand.u32 (!%p190_p9), 1, %s539_s9  }
  0x29   : > { %193 = sbr.rel (%p190_p9) target bundleno = 202 (0xca), region = 47  ;;  %524 = vset.pattern.permute.xlu1 (!%p190_p9), %v549_v32  ;;  %523 = vset.pattern.permute.xlu0 (!%p190_p9), %v549_v32  ;;  %v249_v34 = vld [vmem:[%s833_s0 + $0x8] sm:$0xff] (!%p190_p9)  ;;  %v252_v36 = vld [vmem:[%s833_s0 + $0x20] sm:$0xff] (!%p190_p9) }
  0x2a   : > { %266 = vperm.xlu1 (!%p190_p9), %524, %v250_v30   ;;  %256 = vperm.xlu0 (!%p190_p9), %523, %v248_v31   ;;  %v253_v35 = vld [vmem:[%s833_s0 + $0x28] sm:$0xff] (!%p190_p9)  ;;  %s497_s15 = smul.u32 (!%p190_p9), 240, %s196_s14 }
  0x2c   : > { %s690_s18 = scalar_lea.vmem (!%p190_p9), [#allocation2], %s497_s15  ;;  %s707_s9 = scalar_lea.vmem (!%p190_p9), [#allocation3], %s497_s15 }
  0x2d   : > { %v228_v37 = vld [vmem:[%s690_s18 + $0x50] sm:$0xff] (!%p190_p9)  ;;  %v229_v38 = vld [vmem:[%s690_s18 + $0x58] sm:$0xff] (!%p190_p9)  ;;  %v230_v39 = vld [vmem:[%s690_s18 + $0x60] sm:$0xff] (!%p190_p9) }
  0x2e   : > { %271 = vperm.xlu1 (!%p190_p9), %524, %v251_v33   ;;  %261 = vperm.xlu0 (!%p190_p9), %523, %v249_v34   ;;  %v231_v40 = vld [vmem:[%s690_s18 + $0x68] sm:$0xff] (!%p190_p9)  ;;  %v232_v41 = vld [vmem:[%s690_s18 + $0x70] sm:$0xff] (!%p190_p9)  ;;  %v218_v42 = vld [vmem:[%s690_s18] sm:$0xff] (!%p190_p9) }
  0x2f   : > { %v219_v43 = vld [vmem:[%s690_s18 + $0x8] sm:$0xff] (!%p190_p9)  ;;  %v220_v44 = vld [vmem:[%s690_s18 + $0x10] sm:$0xff] (!%p190_p9)  ;;  %v221_v47 = vld [vmem:[%s690_s18 + $0x18] sm:$0xff] (!%p190_p9) }
  0x30   : > { %v222_v48 = vld [vmem:[%s690_s18 + $0x20] sm:$0xff]  ;;  %v233_v53 = vld [vmem:[%s690_s18 + $0x78] sm:$0xff]  ;;  %v235_v59 = vld [vmem:[%s690_s18 + $0x88] sm:$0xff]  ;;  %s495_s19 = smul.u32 (%p595_p5), 40, %s485_s12 }
  0x31   : > { %v234_v54 = vld [vmem:[%s690_s18 + $0x80] sm:$0xff]  ;;  %v236_v60 = vld [vmem:[%s690_s18 + $0x90] sm:$0xff]  ;;  %v237_v61 = vld [vmem:[%s690_s18 + $0x98] sm:$0xff] }
  0x32   : > { %281 = vperm.xlu1 %524, %v253_v35   ;;  %276 = vperm.xlu0 %523, %v252_v36   ;;  %v223_v0 = vld [vmem:[%s690_s18 + $0x28] sm:$0xff]  ;;  %v224_v1 = vld [vmem:[%s690_s18 + $0x30] sm:$0xff]  ;;  %v225_v2 = vld [vmem:[%s690_s18 + $0x38] sm:$0xff]  ;;  %s767_s20 = scalar_lea.vmem (%p595_p5), %s835_s2, %s495_s19 }
  0x33   : > { %v226_v5 = vld [vmem:[%s690_s18 + $0x40] sm:$0xff]  ;;  %v227_v6 = vld [vmem:[%s690_s18 + $0x48] sm:$0xff]  ;;  %v244_v12 = vld [vmem:[%s690_s18 + $0xd0] sm:$0xff] }
  0x34   : > { %v243_v11 = vld [vmem:[%s690_s18 + $0xc8] sm:$0xff]  ;;  %v245_v17 = vld [vmem:[%s690_s18 + $0xd8] sm:$0xff]  ;;  %v246_v18 = vld [vmem:[%s690_s18 + $0xe0] sm:$0xff] }
  0x35   : > { %v247_v19 = vld [vmem:[%s690_s18 + $0xe8] sm:$0xff]  ;;  %v238_v22 = vld [vmem:[%s690_s18 + $0xa0] sm:$0xff]  ;;  %v240_v24 = vld [vmem:[%s690_s18 + $0xb0] sm:$0xff] }
  0x36   : > { %v239_v23 = vld [vmem:[%s690_s18 + $0xa8] sm:$0xff]  ;;  %v241_v27 = vld [vmem:[%s690_s18 + $0xb8] sm:$0xff]  ;;  %v242_v28 = vld [vmem:[%s690_s18 + $0xc0] sm:$0xff] }
  0xa9   : > { %v267_v45 = vpop.permute.xlu1 %266  ;;  %v257_v46 = vpop.permute.xlu0 %256 }
  0xaa   : > { %v294_v49 = vmul.f32 %v267_v45, %v228_v37  ;;  %v295_v50 = vmul.f32 %v267_v45, %v229_v38  ;;  %v296_v51 = vmul.f32 %v267_v45, %v230_v39  ;;  %v297_v52 = vmul.f32 %v267_v45, %v231_v40 }
  0xab   : > { %v298_v55 = vmul.f32 %v267_v45, %v232_v41  ;;  %v284_v56 = vmul.f32 %v257_v46, %v218_v42  ;;  %v285_v57 = vmul.f32 %v257_v46, %v219_v43  ;;  %v286_v58 = vmul.f32 %v257_v46, %v220_v44 }
  0xac   : > { %324 = vst [vmem:[%s707_s9 + $0x50] sm:$0xff] %v294_v49  ;;  %325 = vst [vmem:[%s707_s9 + $0x58] sm:$0xff] %v295_v50  ;;  %v287_v62 = vmul.f32 %v257_v46, %v221_v47  ;;  %v288_v63 = vmul.f32 %v257_v46, %v222_v48 }
  0xad   : > { %326 = vst [vmem:[%s707_s9 + $0x60] sm:$0xff] %v296_v51  ;;  %327 = vst [vmem:[%s707_s9 + $0x68] sm:$0xff] %v297_v52  ;;  %v272_v3 = vpop.permute.xlu1 %271  ;;  %v262_v4 = vpop.permute.xlu0 %261 }
  0xae   : > { %328 = vst [vmem:[%s707_s9 + $0x70] sm:$0xff] %v298_v55  ;;  %314 = vst [vmem:[%s707_s9] sm:$0xff] %v284_v56  ;;  %v299_v7 = vmul.f32 %v272_v3, %v233_v53  ;;  %v300_v8 = vmul.f32 %v272_v3, %v234_v54  ;;  %v301_v9 = vmul.f32 %v272_v3, %v235_v59 }
  0xaf   : > { %315 = vst [vmem:[%s707_s9 + $0x8] sm:$0xff] %v285_v57  ;;  %316 = vst [vmem:[%s707_s9 + $0x10] sm:$0xff] %v286_v58  ;;  %v302_v10 = vmul.f32 %v272_v3, %v236_v60  ;;  %v303_v13 = vmul.f32 %v272_v3, %v237_v61  ;;  %v289_v14 = vmul.f32 %v262_v4, %v223_v0 }
  0xb0   : > { %317 = vst [vmem:[%s707_s9 + $0x18] sm:$0xff] %v287_v62  ;;  %318 = vst [vmem:[%s707_s9 + $0x20] sm:$0xff] %v288_v63  ;;  %v290_v15 = vmul.f32 %v262_v4, %v224_v1  ;;  %v291_v16 = vmul.f32 %v262_v4, %v225_v2  ;;  %v292_v20 = vmul.f32 %v262_v4, %v226_v5 }
  0xb1   : > { %329 = vst [vmem:[%s707_s9 + $0x78] sm:$0xff] %v299_v7  ;;  %330 = vst [vmem:[%s707_s9 + $0x80] sm:$0xff] %v300_v8  ;;  %v293_v21 = vmul.f32 %v262_v4, %v227_v6  ;;  %v282_v25 = vpop.permute.xlu1 %281  ;;  %v277_v26 = vpop.permute.xlu0 %276 }
  0xb2   : > { %331 = vst [vmem:[%s707_s9 + $0x88] sm:$0xff] %v301_v9  ;;  %332 = vst [vmem:[%s707_s9 + $0x90] sm:$0xff] %v302_v10  ;;  %v309_v29 = vmul.f32 %v282_v25, %v243_v11  ;;  %v310_v30 = vmul.f32 %v282_v25, %v244_v12  ;;  %v311_v31 = vmul.f32 %v282_v25, %v245_v17 }
  0xb3   : > { %333 = vst [vmem:[%s707_s9 + $0x98] sm:$0xff] %v303_v13  ;;  %319 = vst [vmem:[%s707_s9 + $0x28] sm:$0xff] %v289_v14  ;;  %v312_v32 = vmul.f32 %v282_v25, %v246_v18  ;;  %v313_v33 = vmul.f32 %v282_v25, %v247_v19  ;;  %v304_v34 = vmul.f32 %v277_v26, %v238_v22  ;;  %v386_v49 = vld [vmem:[%s707_s9 + $0x50] sm:$0xff] (%p595_p5)  ;;  %v388_v50 = vld [vmem:[%s707_s9 + $0x58] sm:$0xff] (%p595_p5) }
  0xb4   : > { %320 = vst [vmem:[%s707_s9 + $0x30] sm:$0xff] %v290_v15  ;;  %321 = vst [vmem:[%s707_s9 + $0x38] sm:$0xff] %v291_v16  ;;  %v305_v35 = vmul.f32 %v277_v26, %v239_v23  ;;  %v306_v36 = vmul.f32 %v277_v26, %v240_v24  ;;  %v307_v37 = vmul.f32 %v277_v26, %v241_v27  ;;  %350 = sbr.rel (!%p595_p5) target bundleno = 202 (0xca), region = 55  ;;  %v390_v51 = vld [vmem:[%s707_s9 + $0x60] sm:$0xff] (%p595_p5)  ;;  %v392_v52 = vld [vmem:[%s707_s9 + $0x68] sm:$0xff] (%p595_p5) }
  0xb5   : > { %322 = vst [vmem:[%s707_s9 + $0x40] sm:$0xff] %v292_v20  ;;  %323 = vst [vmem:[%s707_s9 + $0x48] sm:$0xff] %v293_v21  ;;  %v308_v38 = vmul.f32 %v277_v26, %v242_v28  ;;  %v366_v39 = vld [vmem:[%s707_s9] sm:$0xff] (%p595_p5)  ;;  %v394_v53 = vld [vmem:[%s707_s9 + $0x70] sm:$0xff] (%p595_p5) }
  0xb6   : > { %339 = vst [vmem:[%s707_s9 + $0xc8] sm:$0xff] %v309_v29  ;;  %340 = vst [vmem:[%s707_s9 + $0xd0] sm:$0xff] %v310_v30  ;;  %v368_v40 = vld [vmem:[%s707_s9 + $0x8] sm:$0xff] (%p595_p5)  ;;  %v370_v41 = vld [vmem:[%s707_s9 + $0x10] sm:$0xff] (%p595_p5) }
  0xb7   : > { %341 = vst [vmem:[%s707_s9 + $0xd8] sm:$0xff] %v311_v31  ;;  %342 = vst [vmem:[%s707_s9 + $0xe0] sm:$0xff] %v312_v32  ;;  %v372_v42 = vld [vmem:[%s707_s9 + $0x18] sm:$0xff] (%p595_p5)  ;;  %v374_v43 = vld [vmem:[%s707_s9 + $0x20] sm:$0xff] (%p595_p5) }
  0xb8   : > { %343 = vst [vmem:[%s707_s9 + $0xe8] sm:$0xff] %v313_v33  ;;  %334 = vst [vmem:[%s707_s9 + $0xa0] sm:$0xff] %v304_v34  ;;  %v396_v54 = vld [vmem:[%s707_s9 + $0x78] sm:$0xff] (%p595_p5)  ;;  %v398_v55 = vld [vmem:[%s707_s9 + $0x80] sm:$0xff] (%p595_p5) }
  0xb9   : > { %335 = vst [vmem:[%s707_s9 + $0xa8] sm:$0xff] %v305_v35  ;;  %336 = vst [vmem:[%s707_s9 + $0xb0] sm:$0xff] %v306_v36  ;;  %v400_v56 = vld [vmem:[%s707_s9 + $0x88] sm:$0xff] (%p595_p5)  ;;  %v402_v57 = vld [vmem:[%s707_s9 + $0x90] sm:$0xff] (%p595_p5) }
  0xba   : > { %337 = vst [vmem:[%s707_s9 + $0xb8] sm:$0xff] %v307_v37  ;;  %338 = vst [vmem:[%s707_s9 + $0xc0] sm:$0xff] %v308_v38  ;;  %v376_v44 = vld [vmem:[%s707_s9 + $0x28] sm:$0xff] (%p595_p5)  ;;  %v404_v58 = vld [vmem:[%s707_s9 + $0x98] sm:$0xff] (%p595_p5) }
  0xbb   : > { %v378_v45 = vld [vmem:[%s707_s9 + $0x30] sm:$0xff]  ;;  %v380_v46 = vld [vmem:[%s707_s9 + $0x38] sm:$0xff]  ;;  %367 = vst [vmem:[%s767_s20] sm:$0xff] %v366_v39  ;;  %369 = vst [vmem:[%s767_s20 + $0x8] sm:$0xff] %v368_v40 }
  0xbc   : > { %v382_v47 = vld [vmem:[%s707_s9 + $0x40] sm:$0xff]  ;;  %371 = vst [vmem:[%s767_s20 + $0x10] sm:$0xff] %v370_v41  ;;  %373 = vst [vmem:[%s767_s20 + $0x18] sm:$0xff] %v372_v42  ;;  %v384_v48 = vld [vmem:[%s707_s9 + $0x48] sm:$0xff] }
  0xbd   : > { %375 = vst [vmem:[%s767_s20 + $0x20] sm:$0xff] %v374_v43  ;;  %377 = vst [vmem:[%s767_s20 + $0xc8] sm:$0xff] %v376_v44  ;;  %v416_v0 = vld [vmem:[%s707_s9 + $0xc8] sm:$0xff]  ;;  %v418_v1 = vld [vmem:[%s707_s9 + $0xd0] sm:$0xff] }
  0xbe   : > { %379 = vst [vmem:[%s767_s20 + $0xd0] sm:$0xff] %v378_v45  ;;  %381 = vst [vmem:[%s767_s20 + $0xd8] sm:$0xff] %v380_v46  ;;  %v420_v2 = vld [vmem:[%s707_s9 + $0xd8] sm:$0xff]  ;;  %v422_v3 = vld [vmem:[%s707_s9 + $0xe0] sm:$0xff] }
  0xbf   : > { %383 = vst [vmem:[%s767_s20 + $0xe0] sm:$0xff] %v382_v47  ;;  %385 = vst [vmem:[%s767_s20 + $0xe8] sm:$0xff] %v384_v48  ;;  %v406_v59 = vld [vmem:[%s707_s9 + $0xa0] sm:$0xff]  ;;  %v424_v4 = vld [vmem:[%s707_s9 + $0xe8] sm:$0xff] }
  0xc0   : > { %387 = vst [vmem:[%s767_s20 + $0x190] sm:$0xff] %v386_v49  ;;  %389 = vst [vmem:[%s767_s20 + $0x198] sm:$0xff] %v388_v50  ;;  %v408_v60 = vld [vmem:[%s707_s9 + $0xa8] sm:$0xff]  ;;  %v410_v61 = vld [vmem:[%s707_s9 + $0xb0] sm:$0xff] }
  0xc1   : > { %391 = vst [vmem:[%s767_s20 + $0x1a0] sm:$0xff] %v390_v51  ;;  %393 = vst [vmem:[%s767_s20 + $0x1a8] sm:$0xff] %v392_v52  ;;  %v412_v62 = vld [vmem:[%s707_s9 + $0xb8] sm:$0xff]  ;;  %v414_v63 = vld [vmem:[%s707_s9 + $0xc0] sm:$0xff] }
  0xc2   : > { %395 = vst [vmem:[%s767_s20 + $0x1b0] sm:$0xff] %v394_v53  ;;  %397 = vst [vmem:[%s767_s20 + $0x258] sm:$0xff] %v396_v54 }
  0xc3   : > { %399 = vst [vmem:[%s767_s20 + $0x260] sm:$0xff] %v398_v55  ;;  %401 = vst [vmem:[%s767_s20 + $0x268] sm:$0xff] %v400_v56 }
  0xc4   : > { %403 = vst [vmem:[%s767_s20 + $0x270] sm:$0xff] %v402_v57  ;;  %405 = vst [vmem:[%s767_s20 + $0x278] sm:$0xff] %v404_v58 }
  0xc5   : > { %407 = vst [vmem:[%s767_s20 + $0x320] sm:$0xff] %v406_v59  ;;  %409 = vst [vmem:[%s767_s20 + $0x328] sm:$0xff] %v408_v60 }
  0xc6   : > { %411 = vst [vmem:[%s767_s20 + $0x330] sm:$0xff] %v410_v61  ;;  %413 = vst [vmem:[%s767_s20 + $0x338] sm:$0xff] %v412_v62 }
  0xc7   : > { %415 = vst [vmem:[%s767_s20 + $0x340] sm:$0xff] %v414_v63  ;;  %417 = vst [vmem:[%s767_s20 + $0x3e8] sm:$0xff] %v416_v0 }
  0xc8   : > { %419 = vst [vmem:[%s767_s20 + $0x3f0] sm:$0xff] %v418_v1  ;;  %421 = vst [vmem:[%s767_s20 + $0x3f8] sm:$0xff] %v420_v2 }
  0xc9   : > { %423 = vst [vmem:[%s767_s20 + $0x400] sm:$0xff] %v422_v3  ;;  %425 = vst [vmem:[%s767_s20 + $0x408] sm:$0xff] %v424_v4 }
  0xca PF: > { %p9_p10 = scmp.ge.s32.totalorder %s582_s13, 7   ;;  %s837_s9 = smov %s543_s10 }
  0xcb   : > { %s838_s10 = smov %s593_s16  ;;  %s839_s11 = smov %s582_s13 }
  0xcc   :  { %11 = sbr.rel (!%p9_p10) target bundleno = 2 (0x2), region = 109 }

</bundles_post_ra>
